<compile_context>
chip_gen: v7x
topology: tpu7x:2x2x1
jax: 0.10.0
libtpu: 0.0.40
codegen_flags: <defaults>
</compile_context>

<pallas_src>
import functools

import jax
import jax.numpy as jnp
from jax.experimental import pallas as pl
from jax.experimental.pallas import tpu as pltpu


_LT = 256                               # samples per grid step in the gather/DMA path
_SMALL_TABLE_BYTES = 2 * 1024 * 1024    # resident-table fast-path budget (v7x 64 MiB safe)


def _rup(x, m):
    return ((x + m - 1) // m) * m


# ---------------------------------------------------------------------------
# Fast path: whole (padded) u8 table resident in VMEM.
#   out = W_bf16 @ table_bf16 - Z     (f32 MXU accumulation)
# W[b, e] = sum of psw*scale over samples of bag b hitting row e (duplicates merged),
# Z[b]    = sum of psw*scale*zp over samples of bag b (exact f32 rank-1 term).
# ---------------------------------------------------------------------------
def _qbag_small_kernel(w_ref, z_ref, tbl_ref, o_ref):
    w = w_ref[...].astype(jnp.bfloat16)            # (BT, E_pad)
    t = tbl_ref[...].astype(jnp.bfloat16)          # (E_pad, D_pad); u8 -> bf16 is exact
    o_ref[...] = jnp.dot(w, t, preferred_element_type=jnp.float32) - z_ref[...]


# ---------------------------------------------------------------------------
# Gather path: per-row DMA gather from HBM, double-buffered across L-tiles.
# ---------------------------------------------------------------------------
def _qbag_gather_kernel(n_tiles, last_cnt,                 # static python ints
                        idx_ref,                           # SMEM (L_pad,) i32 (scalar prefetch)
                        coef_ref, zpc_ref, bag_ref,        # VMEM (1, LT) f32/f32/i32 tiles
                        qw_hbm,                            # ANY  (E_pad, D_pad) u8 (HBM)
                        out_ref,                           # VMEM (B_pad, D_pad) f32 resident acc
                        rows_ref,                          # VMEM (2, LT, D_pad) u8 scratch
                        zp_ref,                            # VMEM (B_pad, 1) f32 scratch
                        sem_ref):                          # DMA sems (2,)
    t = pl.program_id(0)
    LT = rows_ref.shape[1]
    B = out_ref.shape[0]

    def issue(tile, slot, cnt):                            # cnt is a static python int
        base = tile * LT

        @pl.loop(0, cnt)
        def _(i):
            row = idx_ref[base + i]
            pltpu.make_async_copy(qw_hbm.at[pl.ds(row, 1)],
                                  rows_ref.at[slot, pl.ds(i, 1)],
                                  sem_ref.at[slot]).start()

    def start_fetch(tile, slot):
        if last_cnt == LT:                                 # all tiles full (static)
            issue(tile, slot, LT)
            return
        if isinstance(tile, int):                          # static tile id (pipeline prime)
            issue(tile, slot, last_cnt if tile == n_tiles - 1 else LT)
            return

        @pl.when(tile == n_tiles - 1)
        def _():
            issue(tile, slot, last_cnt)

        @pl.when(tile != n_tiles - 1)
        def _():
            issue(tile, slot, LT)

    def wait_fetch(slot):
        # ONE combined wait per tile: the DMA semaphore accumulates bytes, so a single
        # descriptor whose size equals the summed bytes replaces `cnt` per-row waits.
        # (src is a same-shaped dummy VMEM slab; only the byte count / semaphore matter.)
        def wait_cnt(cnt):
            pltpu.make_async_copy(rows_ref.at[1 - slot, pl.ds(0, cnt)],
                                  rows_ref.at[slot, pl.ds(0, cnt)],
                                  sem_ref.at[slot]).wait()

        if last_cnt == LT:
            wait_cnt(LT)
            return

        @pl.when(t == n_tiles - 1)
        def _():
            wait_cnt(last_cnt)

        @pl.when(t != n_tiles - 1)
        def _():
            wait_cnt(LT)

    # --- init resident accumulators & prime the pipeline --------------------
    @pl.when(t == 0)
    def _():
        out_ref[...] = jnp.zeros_like(out_ref)
        zp_ref[...] = jnp.zeros_like(zp_ref)
        start_fetch(0, 0)

    slot = t % 2

    # Issue next tile's DMAs BEFORE waiting on the current tile (other slot, other
    # semaphore), so descriptor issue overlaps the in-flight copies.
    if n_tiles > 1:
        @pl.when(t + 1 < n_tiles)
        def _():
            start_fetch(t + 1, 1 - slot)

    wait_fetch(slot)

    # --- reduce this tile on the MXU -----------------------------------------
    coef = coef_ref[...]                                    # (1, LT) psw*scale[idx]
    zpc = zpc_ref[...]                                      # (1, LT) psw*scale[idx]*zp[idx]
    bag = bag_ref[...]                                      # (1, LT) bag id, -1 for padding
    b_iota = jax.lax.broadcasted_iota(jnp.int32, (B, LT), 0)
    match = bag == b_iota                                   # (B, LT)

    sel = jnp.where(match, coef, 0.0).astype(jnp.bfloat16)  # weighted bag selector
    zp_ref[...] += jnp.where(match, zpc, 0.0).sum(axis=1, keepdims=True)

    q = rows_ref[slot].astype(jnp.bfloat16)                 # (LT, D_pad); stale padded rows
    out_ref[...] += jnp.dot(sel, q, preferred_element_type=jnp.float32)  # masked by sel=0

    # zero-point correction subtracted ONCE in the epilogue (rank-1 broadcast over D)
    @pl.when(t == n_tiles - 1)
    def _():
        out_ref[...] -= zp_ref[...]


class PallasQuantizedEmbeddingBag:
    """quantized::embedding_bag_byte, mode='sum', per-row affine quint8 weights."""

    def __init__(self, qweight, scales, zero_points, include_last_offset=False,
                 mode="sum", table_vmem_budget=_SMALL_TABLE_BYTES, force_gather=False):
        assert mode == "sum", "only mode='sum' (mode=0) is supported, as in the quantized op"
        qweight = jnp.asarray(qweight, jnp.uint8)
        E, D = qweight.shape
        self.num_embeddings = int(E)
        self.embedding_dim = int(D)
        self.D_pad = _rup(int(D), 128)          # lane dim
        self.E_pad = _rup(int(E), 32)           # u8 sublane-tile granularity
        # Pad the table ONCE at init (packed-params analogue) -- never per call.
        self.qweight = jnp.zeros((self.E_pad, self.D_pad), jnp.uint8).at[:E, :D].set(qweight)
        self.scales = jnp.asarray(scales, jnp.float32)
        self.zero_points = jnp.asarray(zero_points, jnp.float32)
        self.include_last_offset = bool(include_last_offset)
        self._small_table = (not force_gather) and (self.E_pad * self.D_pad <= table_vmem_budget)

    # ----------------------------------------------------------------------
    def __call__(self, indices, offsets, per_sample_weights=None):
        indices = jnp.asarray(indices, jnp.int32).reshape(-1)
        offsets = jnp.asarray(offsets, jnp.int32)
        L = int(indices.shape[0])

        if self.include_last_offset:
            num_bags = int(offsets.shape[0]) - 1
            bounds = offsets
        else:
            num_bags = int(offsets.shape[0])
            bounds = jnp.concatenate([offsets, jnp.array([L], jnp.int32)])

        # --- O(L) glue (not the hot path) ---------------------------------
        indices = jnp.clip(indices, 0, self.num_embeddings - 1)   # PyTorch would raise
        pos = jnp.arange(L, dtype=jnp.int32)
        bag_ids = (jnp.searchsorted(bounds, pos, side="right") - 1).astype(jnp.int32)

        if per_sample_weights is None:
            psw = jnp.ones((L,), jnp.float32)
        else:
            psw = jnp.asarray(per_sample_weights, jnp.float32).reshape(-1)

        coef = psw * self.scales[indices]                  # a_i = psw*scale[idx]
        zpc = coef * self.zero_points[indices]             # a_i * zp[idx]

        B_pad = _rup(max(num_bags, 1), 8)
        if self._small_table:
            out = self._forward_resident(indices, bag_ids, coef, zpc, B_pad)
        else:
            out = self._forward_gather(indices, bag_ids, coef, zpc, B_pad, L)
        return out[:num_bags, :self.embedding_dim]

    # ----------------------------------------------------------------------
    def _forward_resident(self, indices, bag_ids, coef, zpc, B_pad):
        E_pad, D_pad = self.E_pad, self.D_pad
        # Merge duplicate (bag, row) samples into the dense per-bag coefficient matrix.
        W = jnp.zeros((B_pad, E_pad), jnp.float32).at[bag_ids, indices].add(coef)
        Z = jnp.zeros((B_pad, 1), jnp.float32).at[bag_ids, 0].add(zpc)

        # Bag-tile the output so the VMEM-resident blocks stay small on every generation.
        bt_cap = max(8, ((4 * 1024 * 1024) // (D_pad * 4)) // 8 * 8)
        BT = min(B_pad, bt_cap)
        Bp = _rup(B_pad, BT)
        if Bp != B_pad:
            W = jnp.zeros((Bp, E_pad), jnp.float32).at[:B_pad].set(W)
            Z = jnp.zeros((Bp, 1), jnp.float32).at[:B_pad].set(Z)

        need = 2 * (BT * E_pad * 4 + BT * 4 + BT * D_pad * 4) + 2 * E_pad * D_pad
        vlim = int(min(64 * 1024 * 1024, max(16 * 1024 * 1024, need * 2)))

        out = pl.pallas_call(
            _qbag_small_kernel,
            out_shape=jax.ShapeDtypeStruct((Bp, D_pad), jnp.float32),
            grid=(Bp // BT,),
            in_specs=[
                pl.BlockSpec((BT, E_pad), lambda b: (b, 0)),      # W
                pl.BlockSpec((BT, 1), lambda b: (b, 0)),          # Z
                pl.BlockSpec((E_pad, D_pad), lambda b: (0, 0)),   # resident u8 table
            ],
            out_specs=pl.BlockSpec((BT, D_pad), lambda b: (b, 0)),
            compiler_params=pltpu.CompilerParams(
                dimension_semantics=("parallel",),
                vmem_limit_bytes=vlim),
            cost_estimate=pl.CostEstimate(
                flops=2 * Bp * E_pad * D_pad,
                transcendentals=0,
                bytes_accessed=Bp * E_pad * 4 + E_pad * D_pad + Bp * D_pad * 4),
        )(W, Z, self.qweight)
        return out

    # ----------------------------------------------------------------------
    def _forward_gather(self, indices, bag_ids, coef, zpc, B_pad, L):
        D_pad = self.D_pad
        # Sort samples by row index for HBM locality of the per-row gather DMAs
        # (bag membership travels with each sample, so the result is unchanged).
        order = jnp.argsort(indices)
        indices = indices[order]
        coef = coef[order]
        zpc = zpc[order]
        bag_ids = bag_ids[order]

        L_pad = _rup(max(L, 1), _LT)
        n_tiles = L_pad // _LT
        last_cnt = max(1, L - (n_tiles - 1) * _LT)

        idx_p = jnp.zeros((L_pad,), jnp.int32).at[:L].set(indices)
        coef_p = jnp.zeros((1, L_pad), jnp.float32).at[0, :L].set(coef)
        zpc_p = jnp.zeros((1, L_pad), jnp.float32).at[0, :L].set(zpc)
        bag_p = jnp.full((1, L_pad), -1, jnp.int32).at[0, :L].set(bag_ids)

        kernel = functools.partial(_qbag_gather_kernel, n_tiles, last_cnt)

        need = 2 * B_pad * D_pad * 4 + 2 * _LT * D_pad + B_pad * 4 + 8 * _LT * 4
        vlim = int(min(64 * 1024 * 1024, max(32 * 1024 * 1024, need * 2)))

        out = pl.pallas_call(
            kernel,
            out_shape=jax.ShapeDtypeStruct((B_pad, D_pad), jnp.float32),
            grid_spec=pltpu.PrefetchScalarGridSpec(
                num_scalar_prefetch=1,
                grid=(n_tiles,),
                in_specs=[
                    pl.BlockSpec((1, _LT), lambda t, idx: (0, t)),   # coef
                    pl.BlockSpec((1, _LT), lambda t, idx: (0, t)),   # zp coef
                    pl.BlockSpec((1, _LT), lambda t, idx: (0, t)),   # bag ids
                    pl.BlockSpec(memory_space=pl.ANY),               # full u8 table in HBM
                ],
                out_specs=pl.BlockSpec((B_pad, D_pad), lambda t, idx: (0, 0)),
                scratch_shapes=[
                    pltpu.VMEM((2, _LT, D_pad), jnp.uint8),          # double-buffered gather
                    pltpu.VMEM((B_pad, 1), jnp.float32),             # zero-point accumulator
                    pltpu.SemaphoreType.DMA((2,)),
                ],
            ),
            compiler_params=pltpu.CompilerParams(
                dimension_semantics=("arbitrary",),                  # reduction into resident out
                vmem_limit_bytes=vlim),
            cost_estimate=pl.CostEstimate(
                flops=2 * B_pad * L_pad * D_pad,
                transcendentals=0,
                bytes_accessed=L_pad * D_pad + B_pad * D_pad * 4 + 4 * L_pad * 4),
        )(idx_p, coef_p, zpc_p, bag_p, self.qweight)
        return out


# ---------------------------------------------------------------------------
# Pure-JAX reference and error bound (psw*scale is rounded to bf16 on the MXU).
# ---------------------------------------------------------------------------
def _reference(qweight, scales, zero_points, indices, offsets, psw, include_last_offset):
    L = indices.shape[0]
    deq = scales[:, None] * (qweight.astype(jnp.float32) - zero_points[:, None])
    if include_last_offset:
        nb = offsets.shape[0] - 1
        bounds = offsets
    else:
        nb = offsets.shape[0]
        bounds = jnp.concatenate([offsets, jnp.array([L], jnp.int32)])
    bag_ids = jnp.searchsorted(bounds, jnp.arange(L, dtype=jnp.int32), side="right") - 1
    w = psw if psw is not None else jnp.ones((L,), jnp.float32)
    ref = jnp.zeros((nb, deq.shape[1]), jnp.float32).at[bag_ids].add(w[:, None] * deq[indices])
    return ref, bag_ids, int(nb)


def _bf16_error_bound(scales, indices, bag_ids, psw, num_bags):
    w = psw if psw is not None else jnp.ones((indices.shape[0],), jnp.float32)
    coef = jnp.abs(w * scales[indices])
    per_bag = jnp.zeros((num_bags,), jnp.float32).at[bag_ids].add(coef)
    return per_bag[:, None] * 255.0 * (2.0 ** -7) + 1e-2


if __name__ == "__main__":
    key = jax.random.PRNGKey(0)
    num_embeddings, embedding_dim = 10, 12
    k1, k2, k3, k4 = jax.random.split(key, 4)

    qweight = jax.random.randint(k1, (num_embeddings, embedding_dim), 0, 256,
                                 dtype=jnp.int32).astype(jnp.uint8)
    scales = jax.random.uniform(k2, (num_embeddings,), jnp.float32, 0.01, 0.1)
    zero_points = jax.random.randint(k3, (num_embeddings,), 0, 256).astype(jnp.float32)

    indices = jnp.array([9, 6, 5, 7, 8, 8, 9, 2, 8, 6, 6, 9, 1, 6, 8, 8,
                         3, 2, 3, 6, 3, 6, 5, 7, 0, 8, 4, 6, 5, 8, 2, 3], jnp.int32)
    psw = jax.random.uniform(k4, (indices.shape[0],), jnp.float32, 0.5, 1.5)

    # case 1: resident-table fast path, include_last_offset=True + per_sample_weights
    offsets_last = jnp.array([0, 19, 20, 28, 28, 32], jnp.int32)     # 5 bags
    m1 = PallasQuantizedEmbeddingBag(qweight, scales, zero_points, include_last_offset=True)
    out1 = jax.block_until_ready(m1(indices, offsets_last, per_sample_weights=psw))
    ref1, bag_ids1, nb1 = _reference(qweight, scales, zero_points, indices, offsets_last,
                                     psw, include_last_offset=True)
    assert out1.shape == (nb1, embedding_dim), out1.shape
    bound1 = _bf16_error_bound(scales, indices, bag_ids1, psw, nb1)
    assert bool(jnp.all(jnp.abs(out1 - ref1) <= bound1)), float(jnp.max(jnp.abs(out1 - ref1)))

    # case 2: resident-table fast path, include_last_offset=False, no per_sample_weights
    offsets = jnp.array([0, 19, 20, 28, 28], jnp.int32)              # 5 bags
    m2 = PallasQuantizedEmbeddingBag(qweight, scales, zero_points, include_last_offset=False)
    out2 = jax.block_until_ready(m2(indices, offsets))
    ref2, bag_ids2, nb2 = _reference(qweight, scales, zero_points, indices, offsets,
                                     None, include_last_offset=False)
    assert out2.shape == (nb2, embedding_dim), out2.shape
    bound2 = _bf16_error_bound(scales, indices, bag_ids2, None, nb2)
    assert bool(jnp.all(jnp.abs(out2 - ref2) <= bound2)), float(jnp.max(jnp.abs(out2 - ref2)))

    # case 3: forced HBM-gather/DMA path (exercises the large-table kernel on the same data)
    m3 = PallasQuantizedEmbeddingBag(qweight, scales, zero_points, include_last_offset=True,
                                     force_gather=True)
    out3 = jax.block_until_ready(m3(indices, offsets_last, per_sample_weights=psw))
    assert out3.shape == (nb1, embedding_dim), out3.shape
    assert bool(jnp.all(jnp.abs(out3 - ref1) <= bound1)), float(jnp.max(jnp.abs(out3 - ref1)))

    print("KERNEL_OK")
</pallas_src>

<mosaic_0001>
module attributes {stable_mosaic.version = 11 : i64} {
  func.func @_qbag_small_kernel(%arg0: i32, %arg1: memref<8x32xf32, #tpu.memory_space<vmem>>, %arg2: memref<8x1xf32, #tpu.memory_space<vmem>>, %arg3: memref<32x128xi8, #tpu.memory_space<vmem>>, %arg4: memref<8x128xf32, #tpu.memory_space<vmem>>) attributes {dimension_semantics = [#tpu.dimension_semantics<parallel>], iteration_bounds = array<i64: 1>, scalar_prefetch = 0 : i64, scratch_operands = 0 : i64, tpu.core_type = #tpu.core_type<tc>, window_params = [{transform_indices = @transform_0, window_bounds = array<i64: 8, 32>}, {transform_indices = @transform_1, window_bounds = array<i64: 8, 1>}, {pipeline_mode = #tpu.pipeline_mode<synchronous>, transform_indices = @transform_2, window_bounds = array<i64: 32, 128>}, {transform_indices = @transform_3, window_bounds = array<i64: 8, 128>}]} {
    %c0 = arith.constant 0 : index
    %c0_0 = arith.constant 0 : index
    %0 = vector.load %arg1[%c0, %c0_0] : memref<8x32xf32, #tpu.memory_space<vmem>>, vector<8x32xf32>
    %1 = arith.truncf %0 : vector<8x32xf32> to vector<8x32xbf16>
    %c0_1 = arith.constant 0 : index
    %c0_2 = arith.constant 0 : index
    %2 = vector.load %arg3[%c0_1, %c0_2] : memref<32x128xi8, #tpu.memory_space<vmem>>, vector<32x128xi8>
    %3 = arith.uitofp %2 : vector<32x128xi8> to vector<32x128xbf16>
    %cst = arith.constant dense<0.000000e+00> : vector<8x128xf32>
    %4 = tpu.matmul %1, %3, %cst {dimension_numbers = #tpu.dot_dimension_numbers<[1], [0], [0], [1], [0, 0, 1, 1], [], []>} : vector<8x32xbf16>, vector<32x128xbf16>, vector<8x128xf32> -> vector<8x128xf32>
    %c0_3 = arith.constant 0 : index
    %c0_4 = arith.constant 0 : index
    %5 = vector.load %arg2[%c0_3, %c0_4] : memref<8x1xf32, #tpu.memory_space<vmem>>, vector<8x1xf32>
    %6 = vector.broadcast %5 : vector<8x1xf32> to vector<8x128xf32>
    %7 = arith.subf %4, %6 : vector<8x128xf32>
    %c0_5 = arith.constant 0 : index
    %c0_6 = arith.constant 0 : index
    %8 = vector.load %arg4[%c0_5, %c0_6] : memref<8x128xf32, #tpu.memory_space<vmem>>, vector<8x128xf32>
    tpu.vector_store %arg4[%c0_5, %c0_6], %7 {strides = array<i32>} : memref<8x128xf32, #tpu.memory_space<vmem>>, vector<8x128xf32>,
    return
  }
  func.func @transform_0(%arg0: i32) -> (i32, i32) {
    %c0_i32 = arith.constant 0 : i32
    %c0_i32_0 = arith.constant 0 : i32
    return %arg0, %c0_i32 : i32, i32
  }
  func.func @transform_1(%arg0: i32) -> (i32, i32) {
    %c0_i32 = arith.constant 0 : i32
    %c0_i32_0 = arith.constant 0 : i32
    return %arg0, %c0_i32 : i32, i32
  }
  func.func @transform_2(%arg0: i32) -> (i32, i32) {
    %c0_i32 = arith.constant 0 : i32
    %c0_i32_0 = arith.constant 0 : i32
    %c0_i32_1 = arith.constant 0 : i32
    return %c0_i32, %c0_i32_0 : i32, i32
  }
  func.func @transform_3(%arg0: i32) -> (i32, i32) {
    %c0_i32 = arith.constant 0 : i32
    %c0_i32_0 = arith.constant 0 : i32
    return %arg0, %c0_i32 : i32, i32
  }
}

</mosaic_0001>

<bundles_post_ra>
// kernel: tpu_custom_call.1
= control target key start
LH: loop header
LB: loop body
LE: loop exit
PB: predicated region body
PF: predicated region fallthrough
CT: control target
= control target key end

     0   :  { %v128_v1 = vmov 0.0   ;;  %vm129_vm0 = vmmov 0   ;;  %s173_s0 = inlined_call_operand.vmem [shape: f32[8,32], index: 0, kind: input, shape index: {}]   ;;  %s174_s1 = inlined_call_operand.vmem [shape: f32[8,1], index: 1, kind: input, shape index: {}]   ;;  %s175_s2 = inlined_call_operand.vmem [shape: u8[32,128], index: 2, kind: input, shape index: {}]   ;;  %s176_s3 = inlined_call_operand.hbm [shape: f32[8,128], index: 3, kind: output, shape index: {}]  }
   0x1   :  { %v18_v0 = vld [vmem:[%s175_s2] sm:$0xff]  ;;  %91 = vmatprep.subr.bf16.mxu0 %v128_v1  ;;  %95 = vmatprep.mubr.msk.bf16.mxu0 %vm129_vm0, %v128_v1 }
   0x2   :  { %v19_v2 = vunpack.c.l.u8.bf16 %v18_v0  ;;  %v65_v3 = vld [vmem:[%s174_s1] sm:$0xff] }
   0x3   :  { %8 = vsyncpa [#allocation3], 0  ;;  %v130_v4 = vmov 0   ;;  %v20_v5 = vunpack.c.h.u8.bf16 %v18_v0  ;;  %v16_v6 = vld [vmem:[%s173_s0] sm:$0xff]  ;;  %vm21_vm1 = vcmask 261120   ;;  %s131_s2 = smov [#allocation2]  }
   0x4   :  { %103 = vset.pattern.permute.xlu0 %v130_v4  ;;  %92 = vmatpush3.bf16.msra.mxu0 %v19_v2  ;;  %v17_v7 = vpack.c.bf16 %v16_v6, %v16_v6  ;;  %s79_s18 = sshll.u32 %s131_s2, 4  ;;  %s80_s18 = int_to_ptr.vmem [resolvable:$true] %s79_s18 }
   0x5   :  { %68 = vperm.xlu0 %103, %v65_v3   ;;  %93 = vmatprep.subr.bf16.mxu0 %v128_v1  ;;  %s104_s1 = scalar_lea.vmem %s80_s18, 128  ;;  %p109_p1 = scmp.lt.s32.totalorder %s80_s18, %s80_s18 }
   0x6   :  { %p105_p0 = scmp.ne.s32.totalorder %s80_s18, %s104_s1  ;;  %p110_p2 = scmp.lt.s32.totalorder %s104_s1, %s104_s1 }
   0x8   :  { %94 = vmatpush3.bf16.msra.mxu0 %v20_v5  ;;  %p111_p3 = por %p110_p2, %p109_p1 }
   0xa   :  { %p112_p4 = pnand %p111_p3, %p105_p0 }
   0xb   :  { %96 = vmatmul.mubr.msk.bf16.vlgmr.msra.gmra.mrb[0].mxu0 %vm21_vm1, %v17_v7 }
  0x84   :  { %v69_v8 = vpop.permute.xlu0 %68 }
  0xde   :  { %v59_v9 = vpop.f32.mrb[0].mxu0 }
  0xdf   :  { %v71_v10 = vsub.f32 %v59_v9, %v69_v8  ;;  %v97_v11 = vpop.f32.mrb[1].mxu0 }
  0xe0   :  { %v62_v12 = vpop.f32.mrb[2].mxu0 }
  0xe1   :  { %72 = vst [vmem:[#allocation2] sm:$0xff] %v71_v10  ;;  %v98_v13 = vpop.f32.mrb[3].mxu0 }
  0xe2   :  { %115 = shalt.err (!%p112_p4)
}
  0xe3   :  { %s116_s20 = scalar_lea.hbm %s176_s3, 128 }
  0xe4   :  { %p117_p5 = scmp.ne.s32.totalorder %s176_s3, %s116_s20  ;;  %p120_p6 = scmp.lt.u32.totalorder %s116_s20, %s176_s3 }
  0xe6   :  { %p122_p7 = pnand %p120_p6, %p117_p5 }
  0xe8   :  { %125 = shalt.err (!%p122_p7)
}
  0xe9   :  { %82 = dma.vmem_to_hbm [thread:$0]  %s80_s18, 128, %s176_s3, [#allocation3]  }
  0xea   :  { %126 = dma.done.wait [#allocation3], 128  }
  0xeb   :  { %127 = vsyncadd [#allocation3], 4294967168 }
  0xec   :  { %86 = vsyncpa [#allocation3], 1 }

</bundles_post_ra>
